<compile_context>
chip_gen: v7x
topology: tpu7x:2x2x1
jax: 0.10.0
libtpu: 0.0.40
codegen_flags: <defaults>
</compile_context>

<pallas_src>
import functools

import jax
import jax.numpy as jnp
from jax.experimental import pallas as pl
from jax.experimental.pallas import tpu as pltpu

F32 = jnp.float32
BF16 = jnp.bfloat16
LANE = 128
BN_EPS = 1e-5
NEG_BIG = -1e30


def _dot(a, b):
    return jnp.dot(a, b, preferred_element_type=jnp.float32)


def _cparams(semantics):
    # 48 MiB scoped VMEM: above the 32 MiB default, below v7x's 64 MiB physical.
    return pltpu.CompilerParams(dimension_semantics=semantics,
                                vmem_limit_bytes=48 * 1024 * 1024)


def _choose_ti(V, C, H, bytes_budget=1 << 20):
    """Largest TI with V % TI == 0 and (TI*C) % 8 == 0 whose e-tile (and the
    tile-local constant matrices) fit the byte budget; falls back to the
    smallest valid TI (explicit guard, no silent over-budget pick)."""
    cands = [t for t in range(1, V + 1) if V % t == 0 and (t * C) % 8 == 0]
    if not cands:
        raise ValueError("need a tile TI with V % TI == 0 and (TI*C) % 8 == 0")
    fitting = [t for t in cands
               if t * V * C * H * 4 <= bytes_budget
               and 3 * (t * V * C) * (t * C) * 4 <= (4 << 20)]
    return max(fitting) if fitting else min(cands)


# ----------------------------------------------------------------------------
# Kernel 1: node input embedding (one batch element per grid step).
#   x0[(b,i,c), :H/2] = mean_c' Embedding(x_nodes[b,i,c'])
#   x0[(b,i,c), H/2:] = x_commodities[b,c] * W_commodity
# The two halves are produced by weights pre-padded to H columns in the glue,
# so no in-kernel lane concatenation is needed.  AMEAN is the tiny per-batch
# commodity-mean matrix.
# ----------------------------------------------------------------------------
def node_embed_kernel(ids_ref, comm_ref, embpad_ref, wcpad_ref, amean_ref, x0_ref):
    vc = ids_ref.shape[0]
    voc = embpad_ref.shape[0]
    classes = jax.lax.broadcasted_iota(jnp.int32, (vc, voc), 1)
    onehot = jnp.where(ids_ref[...] == classes, 1.0, 0.0).astype(F32)
    node_emb = _dot(onehot, embpad_ref[...])           # (VC, H), cols [H/2:] zero
    x_agg = _dot(amean_ref[...], node_emb)             # commodity mean, re-broadcast
    c_emb = comm_ref[...] * wcpad_ref[...]             # (VC,1)*(1,H), cols [:H/2] zero
    x0_ref[...] = x_agg + c_emb


# ----------------------------------------------------------------------------
# Kernel 2: fused x-stream BN(prev layer)+ReLU+residual and node projections.
#   x_new  = x_prev + relu(x_tmp_prev * scale_x + shift_x)
#   proj[k] = x_new @ W_k + b_k    for k in {V_e, U_n, V_n}   -> (3, VC, H)
# For layer 0, scale_x = shift_x = 0 so x_new == x0 (no BN to fuse yet).
# ----------------------------------------------------------------------------
def node_proj_kernel(xprev_ref, xtmpp_ref, scx_ref, shx_ref, w3_ref, b3_ref,
                     xstate_ref, proj_ref):
    x_new = xprev_ref[...] + jnp.maximum(
        xtmpp_ref[...] * scx_ref[...] + shx_ref[...], 0.0)
    xstate_ref[...] = x_new
    for k in range(3):
        proj_ref[k] = (_dot(x_new, w3_ref[k]) + b3_ref[k]).astype(proj_ref.dtype)


# ----------------------------------------------------------------------------
# Kernel 3: gated edge update + neighbour aggregation for one tile of TI source
# nodes x all V neighbours of one batch element.
#   e_tmp = U_e(e_in) + V_e(x)_i + V_e(x)_j ; gate = sigmoid(e_tmp)
#   x_tmp = U_n(x)_i + sum_j gate*V_n(x)_j  [/ sum_j gate if aggregation=mean]
# The layer input e_in is (re)built on the fly:
#   first layer : e_in = cap * W_edge                      (fused edge embedding)
#   later layers: e_in = e_prev + relu(e_tmp_prev*sc+sh)   (fused BN+residual)
# The i/j broadcasts and the sum over j use tiny tile-local constant matrices
# (BI, BJ, SUMJ) on the MXU -- no concatenate replication on the VPU/load-store
# slots.  Per-tile f32 sum / sum-of-squares are emitted so BatchNorm stays
# global; the big e outputs are stored as bf16.
# ----------------------------------------------------------------------------
def _gcn_edge_core(e_in, proj_ref, weu_ref, beu_ref, bi_ref, bj_ref, sumj_ref,
                   e_state_ref, e_tmp_ref, xtmp_ref, stats_ref, aggregation):
    h = weu_ref.shape[0]
    rx = bi_ref.shape[1]
    i0 = pl.multiple_of(pl.program_id(1) * rx, rx)

    e_state_ref[...] = e_in.astype(e_state_ref.dtype)          # residual base

    ue = _dot(e_in, weu_ref[...]) + beu_ref[...]               # U_e(e_in)
    vexj = proj_ref[0].astype(F32)                             # (VC, H)
    vnxj = proj_ref[2].astype(F32)
    vexi = proj_ref[0, pl.ds(i0, rx), :].astype(F32)           # (RX, H) i-tile
    unxi = proj_ref[1, pl.ds(i0, rx), :].astype(F32)

    e_tmp = ue + _dot(bi_ref[...], vexi) + _dot(bj_ref[...], vexj)
    e_tmp_ref[...] = e_tmp.astype(e_tmp_ref.dtype)

    gate = jax.nn.sigmoid(e_tmp)
    num = _dot(sumj_ref[...], gate * _dot(bj_ref[...], vnxj))  # sum_j gate*Vnx_j
    if aggregation == "mean":
        agg = num / (1e-20 + _dot(sumj_ref[...], gate))
    else:  # "sum"
        agg = num
    x_tmp = unxi + agg
    xtmp_ref[...] = x_tmp

    se = jnp.sum(e_tmp, axis=0, keepdims=True)
    sse = jnp.sum(e_tmp * e_tmp, axis=0, keepdims=True)
    sx = jnp.sum(x_tmp, axis=0, keepdims=True)
    ssx = jnp.sum(x_tmp * x_tmp, axis=0, keepdims=True)
    sub = jax.lax.broadcasted_iota(jnp.int32, (8, h), 0)
    stats = (jnp.where(sub == 0, se, 0.0) + jnp.where(sub == 1, sse, 0.0) +
             jnp.where(sub == 2, sx, 0.0) + jnp.where(sub == 3, ssx, 0.0))
    stats_ref[...] = stats[None]


def gcn_edge_first_kernel(cap_ref, we_ref, proj_ref, weu_ref, beu_ref,
                          bi_ref, bj_ref, sumj_ref,
                          e_state_ref, e_tmp_ref, xtmp_ref, stats_ref,
                          *, aggregation):
    e_in = cap_ref[...] * we_ref[...]                          # fused edge embedding
    _gcn_edge_core(e_in, proj_ref, weu_ref, beu_ref, bi_ref, bj_ref, sumj_ref,
                   e_state_ref, e_tmp_ref, xtmp_ref, stats_ref, aggregation)


def gcn_edge_kernel(e_prev_ref, e_tmpp_ref, sce_ref, she_ref, proj_ref,
                    weu_ref, beu_ref, bi_ref, bj_ref, sumj_ref,
                    e_state_ref, e_tmp_ref, xtmp_ref, stats_ref,
                    *, aggregation):
    e_in = e_prev_ref[...].astype(F32) + jnp.maximum(
        e_tmpp_ref[...].astype(F32) * sce_ref[...] + she_ref[...], 0.0)
    _gcn_edge_core(e_in, proj_ref, weu_ref, beu_ref, bi_ref, bj_ref, sumj_ref,
                   e_state_ref, e_tmp_ref, xtmp_ref, stats_ref, aggregation)


# ----------------------------------------------------------------------------
# Kernel 4: fused final edge BN+ReLU+residual, MLP over edge features and the
# class-weighted NLL loss.  Classes are padded to 128 lanes for the softmax
# matmul (weight 0 / bias -1e30 padding), but y_pred is stored narrow (RE, O)
# via an equivalent tiny (H, O) matmul; per-tile weighted-NLL partial sums are
# emitted and the final weighted mean is a tiny glue divide.
# ----------------------------------------------------------------------------
def make_mlp_loss_kernel(num_hidden):
    def kernel(*refs):
        it = iter(refs)
        e_prev = next(it)[...].astype(F32)
        e_tmpp = next(it)[...].astype(F32)
        sce = next(it)[...]
        she = next(it)[...]
        h_val = e_prev + jnp.maximum(e_tmpp * sce + she, 0.0)
        for _ in range(num_hidden):
            w_ref, b_ref = next(it), next(it)
            h_val = jnp.maximum(_dot(h_val, w_ref[...]) + b_ref[...], 0.0)
        wpad_ref, bpad_ref = next(it), next(it)
        wsm_ref, bsm_ref = next(it), next(it)
        y_ref, cw_ref = next(it), next(it)
        ypred_ref, part_ref = next(it), next(it)

        logits = _dot(h_val, wpad_ref[...]) + bpad_ref[...]          # (RE, 128)
        ypred_ref[...] = _dot(h_val, wsm_ref[...]) + bsm_ref[...]    # (RE, O)

        m = jnp.max(logits, axis=-1, keepdims=True)
        lse = m + jnp.log(jnp.sum(jnp.exp(logits - m), axis=-1, keepdims=True))
        logp = logits - lse
        classes = jax.lax.broadcasted_iota(jnp.int32, logits.shape, 1)
        onehot = jnp.where(classes == y_ref[...], 1.0, 0.0).astype(F32)
        w_i = jnp.sum(onehot * cw_ref[...], axis=-1, keepdims=True)      # (RE,1)
        nll_i = -jnp.sum(onehot * logp, axis=-1, keepdims=True)          # (RE,1)

        per_row = jnp.where(classes == 0, w_i * nll_i,
                            jnp.where(classes == 1, w_i, 0.0))           # (RE,128)
        part_vec = jnp.sum(per_row, axis=0, keepdims=True)               # (1,128)
        sub = jax.lax.broadcasted_iota(jnp.int32, (8, LANE), 0)
        part_ref[...] = jnp.where(sub == 0, part_vec, 0.0)[None]
    return kernel


# ----------------------------------------------------------------------------
# Parameters (deterministic synthetic init; Linear weights stored pre-transposed
# as (in, out) == W.T; biases as (1, out)).
# ----------------------------------------------------------------------------
def init_params(key, cfg):
    H = cfg["hidden_dim"]
    keys = iter(jax.random.split(key, 128))

    def nrm(shape, scale=0.1):
        return scale * jax.random.normal(next(keys), shape, F32)

    params = {
        "node_emb": nrm((cfg["voc_nodes_in"], H // 2)),   # nn.Embedding(voc_nodes_in, H/2)
        "comm_w": nrm((1, H // 2)),                       # nn.Linear(1, H/2, bias=False).weight.T
        "edge_w": nrm((1, H)),                            # nn.Linear(1, H, bias=False).weight.T
        "gcn_layers": [],
        "mlp": [],
    }
    for _ in range(cfg["num_layers"]):
        params["gcn_layers"].append({
            "edge_U_w": nrm((H, H)), "edge_U_b": nrm((1, H)),
            "edge_V_w": nrm((H, H)), "edge_V_b": nrm((1, H)),
            "node_U_w": nrm((H, H)), "node_U_b": nrm((1, H)),
            "node_V_w": nrm((H, H)), "node_V_b": nrm((1, H)),
            "bn_edge_g": jnp.ones((1, H), F32), "bn_edge_b": jnp.zeros((1, H), F32),
            "bn_node_g": jnp.ones((1, H), F32), "bn_node_b": jnp.zeros((1, H), F32),
        })
    for _ in range(cfg["mlp_layers"] - 1):
        params["mlp"].append((nrm((H, H)), nrm((1, H))))
    params["mlp"].append((nrm((H, cfg["voc_edges_out"])), nrm((1, cfg["voc_edges_out"]))))
    return params


# ----------------------------------------------------------------------------
# Forward pass (JAX glue + Pallas kernels).
# ----------------------------------------------------------------------------
def forward(params, cfg, x_edges, x_commodities, x_edges_capacity, x_nodes,
            y_edges, edge_cw):
    del x_edges  # not used by the reference forward pass
    B = x_nodes.shape[0]
    V, C, H = cfg["num_nodes"], cfg["num_commodities"], cfg["hidden_dim"]
    O = cfg["voc_edges_out"]
    H2 = H // 2
    VC = V * C
    Nx, Ne = B * VC, B * V * VC
    assert H % 2 == 0 and O <= LANE and VC % 8 == 0

    TI = _choose_ti(V, C, H)         # source nodes per edge tile
    RE = TI * VC                     # edge rows per tile
    RX = TI * C                      # node rows per tile
    NIB = V // TI
    NBLK = B * NIB                   # number of edge tiles (== Ne // RE)

    # ---- glue: flatten inputs into the documented layout ----
    ids_flat = x_nodes.reshape(Nx, 1).astype(jnp.int32)
    comm_flat = jnp.broadcast_to(
        x_commodities[:, None, :].astype(F32), (B, V, C)).reshape(Nx, 1)
    cap_flat = jnp.broadcast_to(
        x_edges_capacity[..., None].astype(F32), (B, V, V, C)).reshape(Ne, 1)
    y_flat = y_edges.reshape(Ne, 1).astype(jnp.int32)
    cw_pad = jnp.zeros((1, LANE), F32).at[0, :O].set(jnp.asarray(edge_cw, F32))

    # ---- glue: tiny tile-local structural constants (shared by all layers) ----
    row = jnp.arange(RE)
    src = (row // VC) * C + (row % C)            # node row (i_local,c) of edge row
    jc = row % VC                                # node row (j,c) of edge row
    BI = (src[:, None] == jnp.arange(RX)[None, :]).astype(F32)   # (RE, RX)
    BJ = (jc[:, None] == jnp.arange(VC)[None, :]).astype(F32)    # (RE, VC)
    SUMJ = BI.T                                                  # (RX, RE)
    rvc = jnp.arange(VC)
    AMEAN = jnp.where(rvc[:, None] // C == rvc[None, :] // C, 1.0 / C, 0.0).astype(F32)

    # padded input-embedding weights (avoid in-kernel lane concatenation)
    emb_pad = jnp.zeros((cfg["voc_nodes_in"], H), F32).at[:, :H2].set(params["node_emb"])
    wc_pad = jnp.zeros((1, H), F32).at[:, H2:].set(params["comm_w"])

    # ---- BlockSpec helpers ----
    def rows1(shape):
        return pl.BlockSpec(shape, lambda g: (g,) + (0,) * (len(shape) - 1))

    def const1(shape):
        return pl.BlockSpec(shape, lambda g: (0,) * len(shape))

    def erow2(shape):
        return pl.BlockSpec(shape, lambda b, i: (b * NIB + i,) + (0,) * (len(shape) - 1))

    def const2(shape):
        return pl.BlockSpec(shape, lambda b, i: (0,) * len(shape))

    # ---- kernel 1: node embeddings ----
    x_state = pl.pallas_call(
        node_embed_kernel,
        grid=(B,),
        out_shape=jax.ShapeDtypeStruct((Nx, H), F32),
        in_specs=[rows1((VC, 1)), rows1((VC, 1)),
                  const1((cfg["voc_nodes_in"], H)), const1((1, H)),
                  const1((VC, VC))],
        out_specs=rows1((VC, H)),
        compiler_params=_cparams(("parallel",)),
    )(ids_flat, comm_flat, emb_pad, wc_pad, AMEAN)

    # ---- GCN layers ----
    x_tmp_prev = x_state                       # dummy for layer 0 (scale_x == 0)
    scale_x = jnp.zeros((1, H), F32)
    shift_x = jnp.zeros((1, H), F32)
    e_state = e_tmp_prev = scale_e = shift_e = None

    for li, lp in enumerate(params["gcn_layers"]):
        w3 = jnp.stack([lp["edge_V_w"], lp["node_U_w"], lp["node_V_w"]])   # (3,H,H)
        b3 = jnp.stack([lp["edge_V_b"], lp["node_U_b"], lp["node_V_b"]])   # (3,1,H)

        # node projections (+ fused x-stream BN/ReLU/residual of previous layer)
        x_state, proj = pl.pallas_call(
            node_proj_kernel,
            grid=(B,),
            out_shape=(jax.ShapeDtypeStruct((Nx, H), F32),
                       jax.ShapeDtypeStruct((3, Nx, H), F32)),
            in_specs=[rows1((VC, H)), rows1((VC, H)), const1((1, H)), const1((1, H)),
                      const1((3, H, H)), const1((3, 1, H))],
            out_specs=(rows1((VC, H)),
                       pl.BlockSpec((3, VC, H), lambda g: (0, g, 0))),
            compiler_params=_cparams(("parallel",)),
        )(x_state, x_tmp_prev, scale_x, shift_x, w3, b3)

        out_shapes = (jax.ShapeDtypeStruct((Ne, H), BF16),        # e_in (residual base)
                      jax.ShapeDtypeStruct((Ne, H), BF16),        # e_tmp (pre-BN)
                      jax.ShapeDtypeStruct((Nx, H), F32),         # x_tmp (pre-BN)
                      jax.ShapeDtypeStruct((NBLK, 8, H), F32))    # per-tile BN stats
        out_specs = (erow2((RE, H)), erow2((RE, H)), erow2((RX, H)),
                     pl.BlockSpec((1, 8, H), lambda b, i: (b * NIB + i, 0, 0)))
        common_specs = [pl.BlockSpec((3, VC, H), lambda b, i: (0, b, 0)),
                        const2((H, H)), const2((1, H)),
                        const2((RE, RX)), const2((RE, VC)), const2((RX, RE))]
        common_args = (proj, lp["edge_U_w"], lp["edge_U_b"], BI, BJ, SUMJ)

        if li == 0:
            kern = functools.partial(gcn_edge_first_kernel,
                                     aggregation=cfg["aggregation"])
            e_state, e_tmp_prev, x_tmp_prev, stats = pl.pallas_call(
                kern, grid=(B, NIB), out_shape=out_shapes,
                in_specs=[erow2((RE, 1)), const2((1, H))] + common_specs,
                out_specs=out_specs,
                compiler_params=_cparams(("parallel", "parallel")),
            )(cap_flat, params["edge_w"], *common_args)
        else:
            kern = functools.partial(gcn_edge_kernel,
                                     aggregation=cfg["aggregation"])
            e_state, e_tmp_prev, x_tmp_prev, stats = pl.pallas_call(
                kern, grid=(B, NIB), out_shape=out_shapes,
                in_specs=[erow2((RE, H)), erow2((RE, H)),
                          const2((1, H)), const2((1, H))] + common_specs,
                out_specs=out_specs,
                compiler_params=_cparams(("parallel", "parallel")),
            )(e_state, e_tmp_prev, scale_e, shift_e, *common_args)

        # tiny glue: finalize GLOBAL BatchNorm stats (eps=1e-5, biased var, f32)
        tot = jnp.sum(stats, axis=0)                     # (8, H)
        mean_e = (tot[0] / Ne)[None, :]
        var_e = jnp.maximum(tot[1] / Ne - mean_e[0] ** 2, 0.0)[None, :]
        scale_e = lp["bn_edge_g"] * jax.lax.rsqrt(var_e + BN_EPS)
        shift_e = lp["bn_edge_b"] - mean_e * scale_e
        mean_x = (tot[2] / Nx)[None, :]
        var_x = jnp.maximum(tot[3] / Nx - mean_x[0] ** 2, 0.0)[None, :]
        scale_x = lp["bn_node_g"] * jax.lax.rsqrt(var_x + BN_EPS)
        shift_x = lp["bn_node_b"] - mean_x * scale_x

    # ---- kernel 4: fused final edge BN + MLP + weighted NLL loss ----
    num_hidden = cfg["mlp_layers"] - 1
    w_last, b_last = params["mlp"][-1]
    w_last_pad = jnp.zeros((H, LANE), F32).at[:, :O].set(w_last)
    b_last_pad = jnp.full((1, LANE), NEG_BIG, F32).at[0, :O].set(b_last[0])

    mlp_args = [e_state, e_tmp_prev, scale_e, shift_e]
    in_specs = [rows1((RE, H)), rows1((RE, H)), const1((1, H)), const1((1, H))]
    for w, b in params["mlp"][:-1]:
        mlp_args += [w, b]
        in_specs += [const1((H, H)), const1((1, H))]
    mlp_args += [w_last_pad, b_last_pad, w_last, b_last, y_flat, cw_pad]
    in_specs += [const1((H, LANE)), const1((1, LANE)),
                 const1((H, O)), const1((1, O)),
                 rows1((RE, 1)), const1((1, LANE))]

    y_pred_flat, parts = pl.pallas_call(
        make_mlp_loss_kernel(num_hidden),
        grid=(NBLK,),
        out_shape=(jax.ShapeDtypeStruct((Ne, O), F32),
                   jax.ShapeDtypeStruct((NBLK, 8, LANE), F32)),
        in_specs=in_specs,
        out_specs=(rows1((RE, O)),
                   pl.BlockSpec((1, 8, LANE), lambda g: (g, 0, 0))),
        compiler_params=_cparams(("parallel",)),
    )(*mlp_args)

    y_pred_edges = y_pred_flat.reshape(B, V, V, C, O)
    loss = jnp.sum(parts[:, 0, 0]) / jnp.sum(parts[:, 0, 1])
    # TODO(synk): dropout_rate exists in the config but the reference forward
    # pass applies no dropout (inference-style GCN layers), so none is applied.
    return y_pred_edges, loss


if __name__ == "__main__":
    cfg = dict(num_nodes=8, num_commodities=4, voc_nodes_in=4, voc_edges_in=3,
               voc_edges_out=2, hidden_dim=32, num_layers=2, mlp_layers=2,
               aggregation="mean", dropout_rate=0.2)
    B = 2
    V, C = cfg["num_nodes"], cfg["num_commodities"]

    key = jax.random.PRNGKey(0)
    k0, k1, k2, k3, k4, kp = jax.random.split(key, 6)
    x_edges = jax.random.randint(k0, (B, V, V), 0, 2)                       # unused by forward
    x_commodities = jax.random.uniform(k1, (B, C), F32)
    x_edges_capacity = jax.random.uniform(k2, (B, V, V), F32)
    x_nodes = jax.random.randint(k3, (B, V, C), 0, cfg["voc_nodes_in"])
    # TODO(synk): docstring says y_edges is (B, num_edges, C); targets are taken as
    # per-edge-per-commodity class indices (B, V, V, C) to match y_pred_edges.
    y_edges = jax.random.randint(k4, (B, V, V, C), 0, cfg["voc_edges_out"])
    edge_cw = [1.0, 2.5]

    params = init_params(kp, cfg)
    y_pred_edges, loss = forward(params, cfg, x_edges, x_commodities,
                                 x_edges_capacity, x_nodes, y_edges, edge_cw)
    jax.block_until_ready((y_pred_edges, loss))
    assert y_pred_edges.shape == (B, V, V, C, cfg["voc_edges_out"])
    assert bool(jnp.isfinite(loss))
    print("KERNEL_OK")
</pallas_src>

<mosaic_0001>
module attributes {stable_mosaic.version = 11 : i64} {
  func.func @node_embed_kernel(%arg0: i32, %arg1: memref<32x1xi32, #tpu.memory_space<vmem>>, %arg2: memref<32x1xf32, #tpu.memory_space<vmem>>, %arg3: memref<4x32xf32, #tpu.memory_space<vmem>>, %arg4: memref<1x32xf32, #tpu.memory_space<vmem>>, %arg5: memref<32x32xf32, #tpu.memory_space<vmem>>, %arg6: memref<32x32xf32, #tpu.memory_space<vmem>>) attributes {dimension_semantics = [#tpu.dimension_semantics<parallel>], iteration_bounds = array<i64: 2>, scalar_prefetch = 0 : i64, scratch_operands = 0 : i64, tpu.core_type = #tpu.core_type<tc>, window_params = [{transform_indices = @transform_0, window_bounds = array<i64: 32, 1>}, {transform_indices = @transform_1, window_bounds = array<i64: 32, 1>}, {pipeline_mode = #tpu.pipeline_mode<synchronous>, transform_indices = @transform_2, window_bounds = array<i64: 4, 32>}, {pipeline_mode = #tpu.pipeline_mode<synchronous>, transform_indices = @transform_3, window_bounds = array<i64: 1, 32>}, {pipeline_mode = #tpu.pipeline_mode<synchronous>, transform_indices = @transform_4, window_bounds = array<i64: 32, 32>}, {transform_indices = @transform_5, window_bounds = array<i64: 32, 32>}]} {
    %0 = tpu.iota {dimensions = array<i32: 1>} : vector<32x4xi32>
    %c0 = arith.constant 0 : index
    %c0_0 = arith.constant 0 : index
    %1 = vector.load %arg1[%c0, %c0_0] : memref<32x1xi32, #tpu.memory_space<vmem>>, vector<32x1xi32>
    %2 = vector.broadcast %1 : vector<32x1xi32> to vector<32x4xi32>
    %3 = arith.cmpi eq, %2, %0 : vector<32x4xi32>
    %cst = arith.constant 1.000000e+00 : f32
    %cst_1 = arith.constant 0.000000e+00 : f32
    %4 = vector.broadcast %cst : f32 to vector<32x4xf32>
    %5 = vector.broadcast %cst_1 : f32 to vector<32x4xf32>
    %6 = arith.select %3, %4, %5 : vector<32x4xi1>, vector<32x4xf32>
    %c0_2 = arith.constant 0 : index
    %c0_3 = arith.constant 0 : index
    %7 = vector.load %arg3[%c0_2, %c0_3] : memref<4x32xf32, #tpu.memory_space<vmem>>, vector<4x32xf32>
    %cst_4 = arith.constant dense<0.000000e+00> : vector<32x32xf32>
    %8 = tpu.matmul %6, %7, %cst_4 {dimension_numbers = #tpu.dot_dimension_numbers<[1], [0], [0], [1], [0, 0, 1, 1], [], []>} : vector<32x4xf32>, vector<4x32xf32>, vector<32x32xf32> -> vector<32x32xf32>
    %c0_5 = arith.constant 0 : index
    %c0_6 = arith.constant 0 : index
    %9 = vector.load %arg5[%c0_5, %c0_6] : memref<32x32xf32, #tpu.memory_space<vmem>>, vector<32x32xf32>
    %cst_7 = arith.constant dense<0.000000e+00> : vector<32x32xf32>
    %10 = tpu.matmul %9, %8, %cst_7 {dimension_numbers = #tpu.dot_dimension_numbers<[1], [0], [0], [1], [0, 0, 1, 1], [], []>} : vector<32x32xf32>, vector<32x32xf32>, vector<32x32xf32> -> vector<32x32xf32>
    %c0_8 = arith.constant 0 : index
    %c0_9 = arith.constant 0 : index
    %11 = vector.load %arg2[%c0_8, %c0_9] : memref<32x1xf32, #tpu.memory_space<vmem>>, vector<32x1xf32>
    %c0_10 = arith.constant 0 : index
    %c0_11 = arith.constant 0 : index
    %12 = vector.load %arg4[%c0_10, %c0_11] : memref<1x32xf32, #tpu.memory_space<vmem>>, vector<1x32xf32>
    %13 = vector.broadcast %11 : vector<32x1xf32> to vector<32x32xf32>
    %14 = vector.broadcast %12 : vector<1x32xf32> to vector<32x32xf32>
    %15 = arith.mulf %13, %14 : vector<32x32xf32>
    %16 = arith.addf %10, %15 : vector<32x32xf32>
    %c0_12 = arith.constant 0 : index
    %c0_13 = arith.constant 0 : index
    %17 = vector.load %arg6[%c0_12, %c0_13] : memref<32x32xf32, #tpu.memory_space<vmem>>, vector<32x32xf32>
    tpu.vector_store %arg6[%c0_12, %c0_13], %16 {strides = array<i32>} : memref<32x32xf32, #tpu.memory_space<vmem>>, vector<32x32xf32>,
    return
  }
  func.func @transform_0(%arg0: i32) -> (i32, i32) {
    %c0_i32 = arith.constant 0 : i32
    %c0_i32_0 = arith.constant 0 : i32
    return %arg0, %c0_i32 : i32, i32
  }
  func.func @transform_1(%arg0: i32) -> (i32, i32) {
    %c0_i32 = arith.constant 0 : i32
    %c0_i32_0 = arith.constant 0 : i32
    return %arg0, %c0_i32 : i32, i32
  }
  func.func @transform_2(%arg0: i32) -> (i32, i32) {
    %c0_i32 = arith.constant 0 : i32
    %c0_i32_0 = arith.constant 0 : i32
    %c0_i32_1 = arith.constant 0 : i32
    return %c0_i32, %c0_i32_0 : i32, i32
  }
  func.func @transform_3(%arg0: i32) -> (i32, i32) {
    %c0_i32 = arith.constant 0 : i32
    %c0_i32_0 = arith.constant 0 : i32
    %c0_i32_1 = arith.constant 0 : i32
    return %c0_i32, %c0_i32_0 : i32, i32
  }
  func.func @transform_4(%arg0: i32) -> (i32, i32) {
    %c0_i32 = arith.constant 0 : i32
    %c0_i32_0 = arith.constant 0 : i32
    %c0_i32_1 = arith.constant 0 : i32
    return %c0_i32, %c0_i32_0 : i32, i32
  }
  func.func @transform_5(%arg0: i32) -> (i32, i32) {
    %c0_i32 = arith.constant 0 : i32
    %c0_i32_0 = arith.constant 0 : i32
    return %arg0, %c0_i32 : i32, i32
  }
}

</mosaic_0001>

<bundles_post_ra>
// kernel: tpu_custom_call.1
= control target key start
LH: loop header
LB: loop body
LE: loop exit
PB: predicated region body
PF: predicated region fallthrough
CT: control target
= control target key end

     0   :  { %s710_s18 = smov 0   ;;  %s761_s0 = inlined_call_operand.vmem [shape: s32[64,1], index: 0, kind: input, shape index: {}]   ;;  %s762_s1 = inlined_call_operand.vmem [shape: f32[64,1], index: 1, kind: input, shape index: {}]   ;;  %s763_s2 = inlined_call_operand.vmem [shape: f32[4,32], index: 2, kind: input, shape index: {}]   ;;  %s764_s3 = inlined_call_operand.vmem [shape: f32[1,32], index: 3, kind: input, shape index: {}]   ;;  %s765_s4 = inlined_call_operand.vmem [shape: f32[32,32], index: 4, kind: input, shape index: {}]   ;;  %s766_s5 = inlined_call_operand.vmem [shape: f32[64,32], index: 5, kind: output, shape index: {}]  }
   0x1 LB: > { %s588_s19 = sadd.s32 4294967295, %s676_s18   ;;  %p592_p0 = scmp.ge.s32.totalorder %s676_s18, 1  ;;  %s676_s18 = sphi %s710_s18, %s15_s18  }
   0x2   : > { %p199_p1 = scmp.lt.s32.totalorder %s676_s18, 3 }
   0x4   : > { %p200_p2 = pnand %p592_p0, %p199_p1 }
   0x5   : > { %s593_s20 = sshll.u32 (!%p200_p2), %s588_s19, 2  ;;  %v678_v0 = vmov (!%p200_p2), 0   ;;  %v276_v5 = vld [vmem:[%s763_s2] sm:$0xf] (!%p200_p2)  ;;  %vm290_vm0 = vcmask (!%p200_p2), 1043456   ;;  %v250_v10 = vlaneseq (!%p200_p2)  ;;  %vm277_vm1 = vcmask (!%p200_p2), 31744  }
   0x6   : > { %203 = sbr.rel (%p200_p2) target bundleno = 590 (0x24e), region = 40  ;;  %669 = vset.pattern.permute.xlu1 (!%p200_p2), %v678_v0  ;;  %668 = vset.pattern.permute.xlu0 (!%p200_p2), %v678_v0  ;;  %p233_p3 = scmp.lt.s32.totalorder (!%p200_p2), %s593_s20, 7  ;;  %v679_v14 = vmov (!%p200_p2), 0.0   ;;  %v379_v21 = vld [vmem:[%s765_s4] sm:$0xff] (!%p200_p2)  ;;  %vm418_vm6 = vcmask (!%p200_p2), 261120   ;;  %v381_v22 = vld [vmem:[%s765_s4 + $0x10] sm:$0xff] (!%p200_p2) }
   0x7   : > { %624 = vmatprep.subr.msk.mxu0 (!%p200_p2), %vm290_vm0, %v276_v5  ;;  %v251_v11 = vand.u32 (!%p200_p2), 127, %v250_v10  ;;  %643 = vmatprep.mubr.msk.f32.mxu1 (!%p200_p2), %vm418_vm6, %v381_v22  ;;  %v380_v29 = vld [vmem:[%s765_s4 + $0x8] sm:$0xff] (!%p200_p2)  ;;  %v382_v30 = vld [vmem:[%s765_s4 + $0x18] sm:$0xff] (!%p200_p2)  ;;  %v604_v33 = vld [vmem:[%s764_s3] ss:$0 sm:$0xff] (!%p200_p2) }
   0x8   : > { %625 = vmatpush3.msk.msra.mxu0 (!%p200_p2), %vm290_vm0, %v276_v5 }
   0xd   : > { %s768_s20 = smov (!%p233_p3, %s593_s20), 7 }
   0xe   : > { %s718_s21 = sshll.u32 %s768_s20, 3 }
   0xf   : > { %s236_s24 = scalar_lea.vmem %s761_s0, %s718_s21  ;;  %s242_s27 = scalar_lea.vmem %s762_s1, %s718_s21 }
  0x10   : > { %v254_v1 = vld [vmem:[%s236_s24 + $0x10] sm:$0xff]  ;;  %v252_v2 = vld [vmem:[%s236_s24] sm:$0xff]  ;;  %v255_v3 = vld [vmem:[%s236_s24 + $0x18] sm:$0xff]  ;;  %s248_s17 = scalar_lea.vmem %s766_s5, %s718_s21 }
  0x11   : > { %263 = vperm.xlu1 %669, %v254_v1   ;;  %257 = vperm.xlu0 %668, %v252_v2   ;;  %v253_v4 = vld [vmem:[%s236_s24 + $0x8] sm:$0xff]  ;;  %v383_v7 = vld [vmem:[%s242_s27] sm:$0xff]  ;;  %v386_v8 = vld [vmem:[%s242_s27 + $0x18] sm:$0xff] }
  0x12   : > { %v384_v6 = vld [vmem:[%s242_s27 + $0x8] sm:$0xff]  ;;  %v385_v9 = vld [vmem:[%s242_s27 + $0x10] sm:$0xff] }
  0x15   : > { %266 = vperm.xlu1 %669, %v255_v3   ;;  %260 = vperm.xlu0 %668, %v253_v4  }
  0x19   : > { %395 = vperm.xlu1 %669, %v384_v6   ;;  %390 = vperm.xlu0 %668, %v383_v7  }
  0x1d   : > { %405 = vperm.xlu1 %669, %v386_v8   ;;  %400 = vperm.xlu0 %668, %v385_v9  }
  0x90   : > { %v264_v12 = vpop.permute.xlu1 %263  ;;  %v258_v13 = vpop.permute.xlu0 %257 }
  0x91   : > { %vm268_vm2 = vcmp.eq.s32.totalorder %v258_v13, %v251_v11  ;;  %vm270_vm3 = vcmp.eq.s32.totalorder %v264_v12, %v251_v11 }
  0x92   : > { %v272_v15 = vsel %vm268_vm2, 1.0, %v679_v14  ;;  %v274_v18 = vsel %vm270_vm3, 1.0, %v679_v14 }
  0x93   : > { %626 = vmatprep.mubr.msk.f32.mxu0 %vm277_vm1, %v272_v15 }
  0x94   : > { %v267_v16 = vpop.permute.xlu1 %266  ;;  %v261_v17 = vpop.permute.xlu0 %260 }
  0x95   : > { %vm269_vm4 = vcmp.eq.s32.totalorder %v261_v17, %v251_v11  ;;  %vm271_vm5 = vcmp.eq.s32.totalorder %v267_v16, %v251_v11 }
  0x96   : > { %v273_v19 = vsel %vm269_vm4, 1.0, %v679_v14  ;;  %v275_v20 = vsel %vm271_vm5, 1.0, %v679_v14 }
  0x97   : > { %627 = vmatmul.mubr.msk.f32.vlgmr.msra.gmra.mrb[0].mxu0 %vm277_vm1, %v273_v19 }
  0x98   : > { %629 = vmatprep.mubr.msk.f32.mxu0 %vm277_vm1, %v274_v18  ;;  %v396_v31 = vpop.permute.xlu1 %395  ;;  %v391_v32 = vpop.permute.xlu0 %390 }
  0x99   : > { %v414_v36 = vmul.f32 %v604_v33, %v391_v32  ;;  %v415_v39 = vmul.f32 %v604_v33, %v396_v31 }
  0x9b   : > { %630 = vmatmul.mubr.msk.f32.gmra.mrb[2].mxu0 %vm277_vm1, %v275_v20 }
  0x9c   : > { %640 = vmatprep.mubr.msk.f32.mxu0 %vm418_vm6, %v379_v21  ;;  %v406_v34 = vpop.permute.xlu1 %405  ;;  %v401_v35 = vpop.permute.xlu0 %400 }
  0x9d   : > { %v416_v42 = vmul.f32 %v604_v33, %v401_v35  ;;  %v417_v44 = vmul.f32 %v604_v33, %v406_v34 }
 0x16a   : > { %v628_v23 = vpop.f32.mrb[0].mxu0 }
 0x16b   : > { %v360_v24 = vpop.f32.mrb[1].mxu0 }
 0x16c   : > { %v646_v25 = vpack.c.bf16 %v628_v23, %v360_v24 }
 0x16e   : > { %v631_v26 = vpop.f32.mrb[2].mxu0  ;;  %647 = vmatprep.subr.bf16.mxu0 %v646_v25  ;;  %654 = vmatprep.subr.bf16.mxu1 %v646_v25 }
 0x16f   : > { %v370_v27 = vpop.f32.mrb[3].mxu0  ;;  %649 = vmatpush3.bf16.msra.mxu0 %v646_v25  ;;  %656 = vmatpush3.bf16.msra.mxu1 %v646_v25 }
 0x170   : > { %v650_v28 = vpack.c.bf16 %v631_v26, %v370_v27 }
 0x172   : > { %651 = vmatprep.subr.bf16.mxu0 %v650_v28  ;;  %655 = vmatprep.subr.bf16.mxu1 %v650_v28 }
 0x173   : > { %653 = vmatpush3.bf16.msra.mxu0 %v650_v28  ;;  %657 = vmatpush3.bf16.msra.mxu1 %v650_v28 }
 0x176   : > { %641 = vmatmul.mubr.msk.f32.vlgmr.msra.gmra.mrb[4].mxu0 %vm418_vm6, %v380_v29  ;;  %644 = vmatmul.mubr.msk.f32.vlgmr.msra.gmra.mrb[0].mxu1 %vm418_vm6, %v382_v30 }
 0x249   : > { %v642_v37 = vpop.f32.mrb[4].mxu0  ;;  %v645_v38 = vpop.f32.mrb[0].mxu1 }
 0x24a   : > { %v497_v40 = vpop.f32.mrb[5].mxu0  ;;  %v507_v41 = vpop.f32.mrb[1].mxu1  ;;  %v503_v45 = vadd.f32 %v642_v37, %v415_v39  ;;  %v513_v47 = vadd.f32 %v645_v38, %v417_v44 }
 0x24b   : > { %v498_v43 = vadd.f32 %v497_v40, %v414_v36  ;;  %v508_v46 = vadd.f32 %v507_v41, %v416_v42 }
 0x24c   : > { %517 = vst.msk [vmem:[%s248_s17 + $0x8] sm:$0xff] %vm418_vm6, %v503_v45  ;;  %519 = vst.msk [vmem:[%s248_s17 + $0x18] sm:$0xff] %vm418_vm6, %v513_v47 }
 0x24d   : > { %516 = vst.msk [vmem:[%s248_s17] sm:$0xff] %vm418_vm6, %v498_v43  ;;  %518 = vst.msk [vmem:[%s248_s17 + $0x10] sm:$0xff] %vm418_vm6, %v508_v46 }
 0x24e PF: > { %s15_s18 = sadd.s32 1, %s676_s18  }
 0x24f   : > { %p12_p4 = scmp.ge.s32.totalorder %s15_s18, 4  }
 0x251   :  { %14 = sbr.rel (!%p12_p4) target bundleno = 1 (0x1), region = 73 }

</bundles_post_ra>
